<compile_context>
chip_gen: v7x
topology: tpu7x:2x2x1
jax: 0.10.0
libtpu: 0.0.40
codegen_flags: <defaults>
</compile_context>

<pallas_src>
import functools

import jax
import jax.numpy as jnp
from jax.experimental import pallas as pl
from jax.experimental.pallas import tpu as pltpu

_LANE = 128


def _round_up(n, m):
    return ((n + m - 1) // m) * m


def _pick_batch_tile(batch, max_tile=1024):
    """Sublane-aligned batch tile; >=2 grid steps for any non-tiny batch."""
    if batch <= 8:
        return batch                      # block == full dim (sublane-rule exemption)
    tb = _round_up(pl.cdiv(batch, 2), 8)  # guarantee >=2 grid steps (v7x dual-TC)
    return min(tb, max_tile)


def _compiler_params(tb, n_in, n_out, param_bytes):
    # Explicit VMEM budget: double-buffered x and out blocks (f32), single-buffered
    # params, 2x margin + 4 MiB for Mosaic internal scratch; clamp to 48 MiB (< v7x 64 MiB).
    tiles = 2 * tb * n_in * 4 + 2 * tb * n_out * 4
    limit = min(max(2 * (tiles + param_bytes) + (4 << 20), 8 << 20), 48 << 20)
    return pltpu.CompilerParams(
        dimension_semantics=("parallel",),
        vmem_limit_bytes=limit)


# ----------------------------- kernels --------------------------------------

def _encoder_kernel(x_ref, w_ref, b_ref, o_ref):
    # x:[tb, nInput] f32, w:[nInput, nNodes] bf16 (K-major), b:[1, nNodes] f32
    x = x_ref[...].astype(jnp.bfloat16)                       # MXU operands in bf16
    y = jnp.dot(x, w_ref[...], preferred_element_type=jnp.float32)
    o_ref[...] = jnp.maximum(y + b_ref[...], 0.0).astype(o_ref.dtype)   # f32 epilogue


def _decoder_kernel(x_ref, w_ref, bd_ref, o_ref):
    # x:[tb, nNodes] f32, w:[nNodes, nInput] bf16, bd:[1, nInput] f32
    x = x_ref[...].astype(jnp.bfloat16)
    y = jnp.dot(x, w_ref[...], preferred_element_type=jnp.float32)
    # jax.nn.sigmoid lowers to the EUP logistic path (its own VLIW slot).
    o_ref[...] = jax.nn.sigmoid(y + bd_ref[...]).astype(o_ref.dtype)


def _autoencoder_kernel(x_ref, w_enc_ref, b_ref, w_dec_ref, bd_ref, o_ref):
    # Fused mode=1 -> mode=2. Hidden dim is padded to 128 (lane-dense intermediate,
    # full-depth contraction in the second matmul); padded lanes are exactly zero
    # through ReLU so they contribute nothing.
    x = x_ref[...].astype(jnp.bfloat16)
    h = jnp.dot(x, w_enc_ref[...], preferred_element_type=jnp.float32)   # [tb, 128]
    h = jnp.maximum(h + b_ref[...], 0.0)
    y = jnp.dot(h.astype(jnp.bfloat16), w_dec_ref[...],
                preferred_element_type=jnp.float32)
    o_ref[...] = jax.nn.sigmoid(y + bd_ref[...]).astype(o_ref.dtype)


# ----------------------------- parameter prep (one-time) ----------------------

def prepare_params(weight, bias, bias_decoder, hidden_pad=_LANE):
    """One-time layout/pad/cast of the module parameters (kept out of the per-call path).

    weight:       [nNodes, nInput]  (PyTorch nn.Linear layout)
    bias:         [nNodes]
    bias_decoder: [nInput]
    """
    n_nodes, n_input = weight.shape
    w_bf16 = weight.astype(jnp.bfloat16)
    b_f32 = bias.astype(jnp.float32)
    hp = _round_up(max(n_nodes, 1), hidden_pad)
    params = {
        # encoder: K-major so the kernel is a plain jnp.dot (no in-kernel transpose)
        "w_enc": jnp.asarray(w_bf16.T),                                # [nInput, nNodes]
        "b_enc": b_f32.reshape(1, n_nodes),
        # decoder: PyTorch layout is already K-major for x @ W
        "w_dec": w_bf16,                                               # [nNodes, nInput]
        "b_dec": bias_decoder.astype(jnp.float32).reshape(1, n_input),
        # fused path: hidden padded to the lane width (zero rows/cols -> numerically identical)
        "w_enc_pad": jnp.zeros((n_input, hp), jnp.bfloat16).at[:, :n_nodes].set(w_bf16.T),
        "b_enc_pad": jnp.zeros((1, hp), jnp.float32).at[0, :n_nodes].set(b_f32),
        "w_dec_pad": jnp.zeros((hp, n_input), jnp.bfloat16).at[:n_nodes, :].set(w_bf16),
    }
    return jax.tree_util.tree_map(jax.device_put, params)


# ----------------------------- forward wrappers --------------------------------

@jax.jit
def _encoder_forward(x, w_km, b):
    batch = x.shape[0]
    n_input, n_nodes = w_km.shape
    tb = _pick_batch_tile(batch)
    grid = (pl.cdiv(batch, tb),)
    param_bytes = w_km.size * 2 + b.size * 4
    cost = pl.CostEstimate(
        flops=2 * batch * n_input * n_nodes,
        transcendentals=0,
        bytes_accessed=x.size * 4 + param_bytes + batch * n_nodes * 4)
    return pl.pallas_call(
        _encoder_kernel,
        out_shape=jax.ShapeDtypeStruct((batch, n_nodes), x.dtype),
        grid=grid,
        in_specs=[
            pl.BlockSpec((tb, n_input), lambda i: (i, 0)),
            pl.BlockSpec((n_input, n_nodes), lambda i: (0, 0)),
            pl.BlockSpec((1, n_nodes), lambda i: (0, 0)),
        ],
        out_specs=pl.BlockSpec((tb, n_nodes), lambda i: (i, 0)),
        compiler_params=_compiler_params(tb, n_input, n_nodes, param_bytes),
        cost_estimate=cost,
    )(x, w_km, b)


@jax.jit
def _decoder_forward(x, w, bd):
    batch = x.shape[0]
    n_nodes, n_input = w.shape
    tb = _pick_batch_tile(batch)
    grid = (pl.cdiv(batch, tb),)
    param_bytes = w.size * 2 + bd.size * 4
    cost = pl.CostEstimate(
        flops=2 * batch * n_nodes * n_input,
        transcendentals=batch * n_input,
        bytes_accessed=x.size * 4 + param_bytes + batch * n_input * 4)
    return pl.pallas_call(
        _decoder_kernel,
        out_shape=jax.ShapeDtypeStruct((batch, n_input), x.dtype),
        grid=grid,
        in_specs=[
            pl.BlockSpec((tb, n_nodes), lambda i: (i, 0)),
            pl.BlockSpec((n_nodes, n_input), lambda i: (0, 0)),
            pl.BlockSpec((1, n_input), lambda i: (0, 0)),
        ],
        out_specs=pl.BlockSpec((tb, n_input), lambda i: (i, 0)),
        compiler_params=_compiler_params(tb, n_nodes, n_input, param_bytes),
        cost_estimate=cost,
    )(x, w, bd)


@jax.jit
def _autoencoder_forward(x, w_enc_pad, b_enc_pad, w_dec_pad, bd):
    # Fused forward(mode=1) -> forward(mode=2): the padded [tb, 128] hidden never
    # leaves VMEM/vregs.
    batch, n_input = x.shape
    hp = w_enc_pad.shape[1]
    tb = _pick_batch_tile(batch)
    grid = (pl.cdiv(batch, tb),)
    param_bytes = (w_enc_pad.size + w_dec_pad.size) * 2 + (b_enc_pad.size + bd.size) * 4
    cost = pl.CostEstimate(
        flops=2 * batch * n_input * hp + 2 * batch * hp * n_input,
        transcendentals=batch * n_input,
        bytes_accessed=x.size * 4 + param_bytes + batch * n_input * 4)
    return pl.pallas_call(
        _autoencoder_kernel,
        out_shape=jax.ShapeDtypeStruct((batch, n_input), x.dtype),
        grid=grid,
        in_specs=[
            pl.BlockSpec((tb, n_input), lambda i: (i, 0)),
            pl.BlockSpec((n_input, hp), lambda i: (0, 0)),
            pl.BlockSpec((1, hp), lambda i: (0, 0)),
            pl.BlockSpec((hp, n_input), lambda i: (0, 0)),
            pl.BlockSpec((1, n_input), lambda i: (0, 0)),
        ],
        out_specs=pl.BlockSpec((tb, n_input), lambda i: (i, 0)),
        compiler_params=_compiler_params(tb, n_input, n_input, param_bytes),
        cost_estimate=cost,
    )(x, w_enc_pad, b_enc_pad, w_dec_pad, bd)


def single_mpl_forward(x, params, mode=1):
    """JAX/Pallas equivalent of singleMPL.forward (params from prepare_params)."""
    if mode == 1:
        return _encoder_forward(x, params["w_enc"], params["b_enc"])
    if mode == 2:
        return _decoder_forward(x, params["w_dec"], params["b_dec"])
    return x  # any other mode: forward() returns x unchanged


def single_mpl_autoencoder(x, params):
    """Fused forward(mode=1) -> forward(mode=2) in a single pallas_call."""
    return _autoencoder_forward(x, params["w_enc_pad"], params["b_enc_pad"],
                                params["w_dec_pad"], params["b_dec"])


# ----------------------------- init + main ------------------------------------

def xavier_uniform(key, shape, dtype=jnp.float32):
    # matches torch.nn.init.xavier_uniform_ for a 2-D weight [fan_out, fan_in]
    fan_out, fan_in = shape
    limit = (6.0 / (fan_in + fan_out)) ** 0.5
    return jax.random.uniform(key, shape, dtype, minval=-limit, maxval=limit)


if __name__ == "__main__":
    n_input, n_nodes, batch = 32, 10, 8

    key = jax.random.PRNGKey(0)
    k_w, k_b, k_bd, k_x1, k_x2 = jax.random.split(key, 5)

    weight = xavier_uniform(k_w, (n_nodes, n_input))               # linear1.weight
    # Module init zeroes these; use small nonzero values so the bias paths are tested.
    bias = 0.1 * jax.random.normal(k_b, (n_nodes,), jnp.float32)   # linear1.bias
    bias_decoder = 0.1 * jax.random.normal(k_bd, (n_input,), jnp.float32)

    params = prepare_params(weight, bias, bias_decoder)            # one-time prep

    x1 = jax.random.normal(k_x1, (batch, n_input), jnp.float32)
    x2 = jax.random.normal(k_x2, (batch, n_nodes), jnp.float32)

    # mode 1: encoder path (Linear + ReLU)
    y1 = jax.block_until_ready(single_mpl_forward(x1, params, mode=1))
    # mode 2: decoder path (tied-weight Linear + biasDecoder + Sigmoid)
    y2 = jax.block_until_ready(single_mpl_forward(x2, params, mode=2))
    # fused autoencoder path (mode 1 then mode 2 in one kernel)
    y3 = jax.block_until_ready(single_mpl_autoencoder(x1, params))

    # f32 references (kernel matmuls use bf16 operands -> loosen tolerance)
    ref1 = jnp.maximum(x1 @ weight.T + bias, 0.0)
    ref2 = jax.nn.sigmoid(x2 @ weight + bias_decoder)
    ref3 = jax.nn.sigmoid(ref1 @ weight + bias_decoder)

    assert y1.shape == (batch, n_nodes) and y2.shape == (batch, n_input)
    assert y3.shape == (batch, n_input)
    assert jnp.allclose(y1, ref1, atol=2e-2), "mode 1 mismatch"
    assert jnp.allclose(y2, ref2, atol=2e-2), "mode 2 mismatch"
    assert jnp.allclose(y3, ref3, atol=2e-2), "fused autoencoder mismatch"

    print("KERNEL_OK")
</pallas_src>

<mosaic_0001>
module attributes {stable_mosaic.version = 11 : i64} {
  func.func @_encoder_kernel(%arg0: i32, %arg1: memref<8x32xf32, #tpu.memory_space<vmem>>, %arg2: memref<32x10xbf16, #tpu.memory_space<vmem>>, %arg3: memref<1x10xf32, #tpu.memory_space<vmem>>, %arg4: memref<8x10xf32, #tpu.memory_space<vmem>>) attributes {dimension_semantics = [#tpu.dimension_semantics<parallel>], iteration_bounds = array<i64: 1>, scalar_prefetch = 0 : i64, scratch_operands = 0 : i64, tpu.core_type = #tpu.core_type<tc>, window_params = [{transform_indices = @transform_0, window_bounds = array<i64: 8, 32>}, {pipeline_mode = #tpu.pipeline_mode<synchronous>, transform_indices = @transform_1, window_bounds = array<i64: 32, 10>}, {pipeline_mode = #tpu.pipeline_mode<synchronous>, transform_indices = @transform_2, window_bounds = array<i64: 1, 10>}, {transform_indices = @transform_3, window_bounds = array<i64: 8, 10>}]} {
    %c0 = arith.constant 0 : index
    %c0_0 = arith.constant 0 : index
    %0 = vector.load %arg1[%c0, %c0_0] : memref<8x32xf32, #tpu.memory_space<vmem>>, vector<8x32xf32>
    %1 = arith.truncf %0 : vector<8x32xf32> to vector<8x32xbf16>
    %c0_1 = arith.constant 0 : index
    %c0_2 = arith.constant 0 : index
    %2 = vector.load %arg2[%c0_1, %c0_2] : memref<32x10xbf16, #tpu.memory_space<vmem>>, vector<32x10xbf16>
    %cst = arith.constant dense<0.000000e+00> : vector<8x10xf32>
    %3 = tpu.matmul %1, %2, %cst {dimension_numbers = #tpu.dot_dimension_numbers<[1], [0], [0], [1], [0, 0, 1, 1], [], []>} : vector<8x32xbf16>, vector<32x10xbf16>, vector<8x10xf32> -> vector<8x10xf32>
    %c0_3 = arith.constant 0 : index
    %c0_4 = arith.constant 0 : index
    %4 = vector.load %arg3[%c0_3, %c0_4] : memref<1x10xf32, #tpu.memory_space<vmem>>, vector<1x10xf32>
    %5 = vector.broadcast %4 : vector<1x10xf32> to vector<8x10xf32>
    %6 = arith.addf %3, %5 : vector<8x10xf32>
    %cst_5 = arith.constant 0.000000e+00 : f32
    %7 = vector.broadcast %cst_5 : f32 to vector<8x10xf32>
    %8 = arith.maximumf %6, %7 : vector<8x10xf32>
    %c0_6 = arith.constant 0 : index
    %c0_7 = arith.constant 0 : index
    %9 = vector.load %arg4[%c0_6, %c0_7] : memref<8x10xf32, #tpu.memory_space<vmem>>, vector<8x10xf32>
    tpu.vector_store %arg4[%c0_6, %c0_7], %8 {strides = array<i32>} : memref<8x10xf32, #tpu.memory_space<vmem>>, vector<8x10xf32>,
    return
  }
  func.func @transform_0(%arg0: i32) -> (i32, i32) {
    %c0_i32 = arith.constant 0 : i32
    %c0_i32_0 = arith.constant 0 : i32
    return %arg0, %c0_i32 : i32, i32
  }
  func.func @transform_1(%arg0: i32) -> (i32, i32) {
    %c0_i32 = arith.constant 0 : i32
    %c0_i32_0 = arith.constant 0 : i32
    %c0_i32_1 = arith.constant 0 : i32
    return %c0_i32, %c0_i32_0 : i32, i32
  }
  func.func @transform_2(%arg0: i32) -> (i32, i32) {
    %c0_i32 = arith.constant 0 : i32
    %c0_i32_0 = arith.constant 0 : i32
    %c0_i32_1 = arith.constant 0 : i32
    return %c0_i32, %c0_i32_0 : i32, i32
  }
  func.func @transform_3(%arg0: i32) -> (i32, i32) {
    %c0_i32 = arith.constant 0 : i32
    %c0_i32_0 = arith.constant 0 : i32
    return %arg0, %c0_i32 : i32, i32
  }
}

</mosaic_0001>

<bundles_post_ra>
// kernel: _encoder_forward.1
= control target key start
LH: loop header
LB: loop body
LE: loop exit
PB: predicated region body
PF: predicated region fallthrough
CT: control target
= control target key end

     0   :  { %v146_v1 = vmov 0.0   ;;  %vm147_vm0 = vmmov 0   ;;  %s193_s0 = inlined_call_operand.vmem [shape: f32[8,32], index: 0, kind: input, shape index: {}]   ;;  %s194_s1 = inlined_call_operand.vmem [shape: bf16[32,10], index: 1, kind: input, shape index: {}]   ;;  %s195_s2 = inlined_call_operand.vmem [shape: f32[1,10], index: 2, kind: input, shape index: {}]   ;;  %s196_s3 = inlined_call_operand.hbm [shape: f32[8,10], index: 3, kind: output, shape index: {}]  }
   0x1   :  { %v120_v0 = vld [vmem:[%s194_s1] sm:$0xff]   ;;  %109 = vmatprep.subr.bf16.mxu0 %v146_v1  ;;  %v121_v2 = vld [vmem:[%s194_s1 + $0x8] sm:$0xff]   ;;  %113 = vmatprep.mubr.msk.bf16.mxu0 %vm147_vm0, %v146_v1 }
   0x2   :  { %110 = vmatpush3.bf16.msra.mxu0 %v120_v0  ;;  %v16_v3 = vld [vmem:[%s193_s0] sm:$0xff] }
   0x3   :  { %8 = vsyncpa [#allocation3], 0  ;;  %111 = vmatprep.subr.bf16.mxu0 %v146_v1  ;;  %v17_v4 = vpack.c.bf16 %v16_v3, %v16_v3  ;;  %vm41_vm1 = vcmask 261120   ;;  %v102_v5 = vld [vmem:[%s195_s2] ss:$0 sm:$0xff]  ;;  %s148_s20 = smov [#allocation2]  }
   0x4   :  { %s94_s21 = sshll.u32 %s148_s20, 4  ;;  %vm86_vm2 = vcmask 80896   ;;  %s95_s21 = int_to_ptr.vmem [resolvable:$true] %s94_s21 }
   0x5   :  { %s122_s0 = scalar_lea.vmem %s95_s21, 128  ;;  %p127_p1 = scmp.lt.s32.totalorder %s95_s21, %s95_s21 }
   0x6   :  { %112 = vmatpush3.bf16.msra.mxu0 %v121_v2  ;;  %p123_p0 = scmp.ne.s32.totalorder %s95_s21, %s122_s0  ;;  %p128_p2 = scmp.lt.s32.totalorder %s122_s0, %s122_s0 }
   0x8   :  { %p129_p3 = por %p128_p2, %p127_p1 }
   0x9   :  { %114 = vmatmul.mubr.msk.bf16.vlgmr.msra.gmra.mrb[0].mxu0 %vm41_vm1, %v17_v4 }
   0xa   :  { %p130_p4 = pnand %p129_p3, %p123_p0 }
  0xdc   :  { %v79_v6 = vpop.f32.mrb[0].mxu0 }
  0xdd   :  { %v80_v7 = vadd.f32 %v102_v5, %v79_v6  ;;  %v115_v8 = vpop.f32.mrb[1].mxu0 }
  0xde   :  { %v82_v9 = vpop.f32.mrb[2].mxu0 }
  0xdf   :  { %v85_v10 = vmax.f32 %v80_v7, 0.0  ;;  %v116_v11 = vpop.f32.mrb[3].mxu0 }
  0xe1   :  { %87 = vst.msk [vmem:[#allocation2] sm:$0xff] %vm86_vm2, %v85_v10 }
  0xe2   :  { %133 = shalt.err (!%p130_p4)
}
  0xe3   :  { %s134_s22 = scalar_lea.hbm %s196_s3, 128 }
  0xe4   :  { %p135_p5 = scmp.ne.s32.totalorder %s196_s3, %s134_s22  ;;  %p138_p6 = scmp.lt.u32.totalorder %s134_s22, %s196_s3 }
  0xe6   :  { %p140_p7 = pnand %p138_p6, %p135_p5 }
  0xe8   :  { %143 = shalt.err (!%p140_p7)
}
  0xe9   :  { %97 = dma.vmem_to_hbm [thread:$0]  %s95_s21, 128, %s196_s3, [#allocation3]  }
  0xea   :  { %144 = dma.done.wait [#allocation3], 128  }
  0xeb   :  { %145 = vsyncadd [#allocation3], 4294967168 }
  0xec   :  { %101 = vsyncpa [#allocation3], 1 }

</bundles_post_ra>
